<compile_context>
chip_gen: v5e
topology: v5e:2x2
jax: 0.10.0
libtpu: 0.0.40
codegen_flags: <defaults>
</compile_context>

<pallas_src>
import functools
import math

import numpy as np

import jax
import jax.numpy as jnp
from jax.experimental import pallas as pl
from jax.experimental.pallas import tpu as pltpu

POLICY_DIM = 2
_LANE = 128
_OUT_COLS = 8          # action head padded to 8 lanes (policy_dim=2 + zero pad)


def _round_up(x: int, m: int) -> int:
    return ((x + m - 1) // m) * m


def _cdiv(a: int, b: int) -> int:
    return -(-a // b)


# Packed-parameter layout: (name, rows, cols); every block starts on an
# 8-row (sublane) boundary inside a [_PARAM_ROWS, 128] f32 slab.
_PARAM_SHAPES = (
    ("w1", 3, 32), ("b1", 1, 32),          # agent_pos_fc1_pi
    ("w2", 32, 32), ("b2", 1, 32),         # agent_pos_fc2_pi
    ("lw1", 4, 64), ("lb1", 1, 64),        # landmark_fc1_pi
    ("lw2", 64, 32), ("lb2", 1, 32),       # landmark_fc2_pi
    ("iwa", 32, 64), ("iwl", 32, 64), ("ib", 1, 64),   # info_fc1_pi (pre-split)
    ("aw", 64, POLICY_DIM), ("ab", 1, POLICY_DIM),      # action_fc1_pi
)
_PARAM_OFFSET = {}
_row = 0
for _name, _rows, _cols in _PARAM_SHAPES:
    _PARAM_OFFSET[_name] = _row
    _row += _round_up(_rows, 8)
_PARAM_ROWS = _row          # = 288 rows -> 288*128*4 B = 144 KiB


def _policy_kernel(agent_ref, lmk_ref, params_ref, out_ref):
    """One batch tile: agent [bt,3], landmarks [L,bt,4] -> actions [bt,8]."""
    f32 = jnp.float32
    P = params_ref

    def w(name, rows, cols):
        r0 = _PARAM_OFFSET[name]
        return P[r0:r0 + rows, 0:cols]

    # Load every weight/bias once from the resident packed slab (static slices).
    w1, b1 = w("w1", 3, 32), w("b1", 1, 32)
    w2, b2 = w("w2", 32, 32), w("b2", 1, 32)
    lw1, lb1 = w("lw1", 4, 64), w("lb1", 1, 64)
    lw2, lb2 = w("lw2", 64, 32), w("lb2", 1, 32)
    iwa, iwl, ib = w("iwa", 32, 64), w("iwl", 32, 64), w("ib", 1, 64)
    aw, ab = w("aw", 64, _OUT_COLS), w("ab", 1, _OUT_COLS)  # cols 2..7 are zero

    relu = lambda x: jnp.maximum(x, 0.0)

    # --- agent-position MLP: 3 -> 32 -> 32 (ReLU) ---
    agent = agent_ref[...]                                               # [bt, 3]
    h = relu(jnp.dot(agent, w1, preferred_element_type=f32) + b1)
    agent_emb = relu(jnp.dot(h, w2, preferred_element_type=f32) + b2)    # [bt, 32]

    # --- landmark MLP: 4 -> 64 -> 32 (ReLU) as TWO stacked matmuls.
    #     [L, bt, 4] -> [L*bt, 4] is layout-free (bt is a multiple of 8). ---
    L, bt = lmk_ref.shape[0], lmk_ref.shape[1]
    x = lmk_ref[...].reshape(L * bt, 4)                                  # [L*bt, 4]
    g = relu(jnp.dot(x, lw1, preferred_element_type=f32) + lb1)          # [L*bt, 64]
    emb = relu(jnp.dot(g, lw2, preferred_element_type=f32) + lb2)        # [L*bt, 32]

    # --- attention scores packed as [bt, L]: per-landmark VPU multiply +
    #     lane reduction, one lane-concat, then a single max/exp/sum/recip ---
    cols = []
    for l in range(L):
        e_l = emb[l * bt:(l + 1) * bt]               # static sublane-aligned view
        cols.append(jnp.sum(agent_emb * e_l, axis=-1, keepdims=True))
    scores = jnp.concatenate(cols, axis=-1) * 0.25                        # [bt, L]

    m = jnp.max(scores, axis=-1, keepdims=True)                           # [bt, 1]
    p = jnp.exp(scores - m)                                               # [bt, L]
    denom = jnp.sum(p, axis=-1, keepdims=True)                            # [bt, 1]
    att = p * pl.reciprocal(denom, approx=True)                           # [bt, L]

    # --- attention-weighted landmark embedding.  The torch ReLU here is a
    #     provable no-op (att >= 0, emb >= 0 post-ReLU), so it is dropped. ---
    lmk_att = att[:, 0:1] * emb[0:bt]
    for l in range(1, L):
        lmk_att = lmk_att + att[:, l:l + 1] * emb[l * bt:(l + 1) * bt]    # [bt, 32]

    # --- info MLP on concat([agent_emb, lmk_att]) realised via split weights ---
    info = relu(jnp.dot(agent_emb, iwa, preferred_element_type=f32)
                + jnp.dot(lmk_att, iwl, preferred_element_type=f32) + ib)  # [bt, 64]

    # --- action head + tanh; 8-lane output (pad lanes compute tanh(0)=0) ---
    out_ref[...] = jnp.tanh(
        jnp.dot(info, aw, preferred_element_type=f32) + ab)               # [bt, 8]


def init_params(seed: int = 0) -> jnp.ndarray:
    """Build the packed [288, 128] f32 parameter slab (torch.nn.Linear-style init)."""
    key = jax.random.PRNGKey(seed)

    def linear(k, fan_in, fan_out):
        k1, k2 = jax.random.split(k)
        bound = 1.0 / math.sqrt(fan_in)
        wgt = jax.random.uniform(k1, (fan_in, fan_out), jnp.float32, -bound, bound)
        bias = jax.random.uniform(k2, (1, fan_out), jnp.float32, -bound, bound)
        return wgt, bias

    keys = jax.random.split(key, 6)
    w1, b1 = linear(keys[0], 3, 32)       # agent_pos_fc1_pi
    w2, b2 = linear(keys[1], 32, 32)      # agent_pos_fc2_pi
    lw1, lb1 = linear(keys[2], 4, 64)     # landmark_fc1_pi
    lw2, lb2 = linear(keys[3], 64, 32)    # landmark_fc2_pi
    iw, ib = linear(keys[4], 64, 64)      # info_fc1_pi
    aw, ab = linear(keys[5], 64, POLICY_DIM)  # action_fc1_pi

    tensors = dict(w1=w1, b1=b1, w2=w2, b2=b2, lw1=lw1, lb1=lb1, lw2=lw2,
                   lb2=lb2, iwa=iw[:32], iwl=iw[32:], ib=ib, aw=aw, ab=ab)
    packed = np.zeros((_PARAM_ROWS, _LANE), np.float32)
    for name, rows, ncols in _PARAM_SHAPES:
        r0 = _PARAM_OFFSET[name]
        packed[r0:r0 + rows, :ncols] = np.asarray(tensors[name])
    return jnp.asarray(packed)


@functools.partial(jax.jit, static_argnames=("num_landmark", "block_b"))
def policy_net_forward(observation, packed_params, *, num_landmark, block_b=512):
    """Equivalent of PolicyNet.forward; supports single or batched observations."""
    obs = observation
    if obs.ndim == 1:
        obs = obs[None, :]
    B = obs.shape[0]
    L = num_landmark

    # Preprocess (cheap XLA ops, fused under jit): agent position + per-landmark
    # features laid out landmark-major as [L, B, 4] = concat(est_pos, info_vec).
    agent_pos = obs[:, :3]
    info_vec = obs[:, 3:3 + 2 * L].reshape(B, L, 2)
    est_pos = obs[:, 3 + 2 * L:3 + 4 * L].reshape(B, L, 2)
    lmk = jnp.transpose(jnp.concatenate([est_pos, info_vec], axis=2), (1, 0, 2))

    b8 = _round_up(B, 8)
    bt = min(block_b, b8)
    # For large batches make the grid have >= 2 steps so the "parallel" batch
    # axis can span both TensorCores on v7x (no-op on single-TC v5e/v6e).
    if b8 >= 16 and bt == b8:
        bt = _round_up(_cdiv(b8, 2), 8)
    bpad = _round_up(b8, bt)
    if bpad != B:
        agent_pos = jnp.pad(agent_pos, ((0, bpad - B), (0, 0)))
        lmk = jnp.pad(lmk, ((0, 0), (0, bpad - B), (0, 0)))

    out = pl.pallas_call(
        _policy_kernel,
        out_shape=jax.ShapeDtypeStruct((bpad, _OUT_COLS), jnp.float32),
        grid=(bpad // bt,),
        in_specs=[
            pl.BlockSpec((bt, 3), lambda i: (i, 0)),
            pl.BlockSpec((L, bt, 4), lambda i: (0, i, 0)),
            # Constant index_map keeps the packed weight slab VMEM-resident
            # across grid steps (no per-step re-DMA).
            pl.BlockSpec((_PARAM_ROWS, _LANE), lambda i: (0, 0)),
        ],
        out_specs=pl.BlockSpec((bt, _OUT_COLS), lambda i: (i, 0)),
        compiler_params=pltpu.CompilerParams(
            dimension_semantics=("parallel",)),
    )(agent_pos, lmk, packed_params)

    action = out[:B, :POLICY_DIM]                       # [B, 2] tanh actions

    # Final scaling follows the original torch hstack semantics exactly.
    if B == 1:
        a = action.reshape(-1)                          # torch .flatten() path
        return jnp.concatenate([a[0:1] * 3.0, a[1:2] * 0.1])        # shape (2,)
    return jnp.concatenate([action[0] * 3.0, action[1] * 0.1])      # shape (4,)


# ---------------------------------------------------------------------------
# Pure-JAX reference (verification only).
# ---------------------------------------------------------------------------
def _unpack(packed, name):
    for n, rows, ncols in _PARAM_SHAPES:
        if n == name:
            r0 = _PARAM_OFFSET[n]
            return packed[r0:r0 + rows, :ncols]
    raise KeyError(name)


def _reference_forward(observation, packed_params, num_landmark):
    obs = observation
    if obs.ndim == 1:
        obs = obs[None, :]
    B, L = obs.shape[0], num_landmark
    g = lambda n: _unpack(packed_params, n)
    relu = lambda x: jnp.maximum(x, 0.0)

    a = relu(obs[:, :3] @ g("w1") + g("b1"))
    a = relu(a @ g("w2") + g("b2"))                                   # [B, 32]
    info_vec = obs[:, 3:3 + 2 * L].reshape(B, L, 2)
    est = obs[:, 3 + 2 * L:3 + 4 * L].reshape(B, L, 2)
    lm = jnp.concatenate([est, info_vec], axis=2)                     # [B, L, 4]
    le = relu(jnp.einsum("bld,do->blo", lm, g("lw1")) + g("lb1"))
    le = relu(jnp.einsum("bld,do->blo", le, g("lw2")) + g("lb2"))     # [B, L, 32]
    att = jax.nn.softmax(jnp.einsum("bd,bld->bl", a, le) / 4.0, axis=-1)
    latt = relu(jnp.einsum("bl,bld->bd", att, le))                    # [B, 32]
    iw = jnp.concatenate([g("iwa"), g("iwl")], axis=0)
    info = relu(jnp.concatenate([a, latt], axis=1) @ iw + g("ib"))
    action = jnp.tanh(info @ g("aw") + g("ab"))
    if B == 1:
        a1 = action.reshape(-1)
        return jnp.concatenate([a1[0:1] * 3.0, a1[1:2] * 0.1])
    return jnp.concatenate([action[0] * 3.0, action[1] * 0.1])


if __name__ == "__main__":
    num_landmark = 8
    input_dim = 3 + 4 * num_landmark        # = 35

    params = init_params(seed=0)

    # Small batch (single tile), single observation, and a larger batch that
    # exercises the multi-tile (grid >= 2) path.
    obs_small = jax.random.normal(jax.random.PRNGKey(0), (4, input_dim), jnp.float32)
    obs_single = obs_small[0]
    obs_big = jax.random.normal(jax.random.PRNGKey(1), (64, input_dim), jnp.float32)

    out_small = policy_net_forward(obs_small, params, num_landmark=num_landmark)
    out_single = policy_net_forward(obs_single, params, num_landmark=num_landmark)
    out_big = policy_net_forward(obs_big, params, num_landmark=num_landmark)
    jax.block_until_ready((out_small, out_single, out_big))

    ref_small = _reference_forward(obs_small, params, num_landmark)
    ref_single = _reference_forward(obs_single, params, num_landmark)
    ref_big = _reference_forward(obs_big, params, num_landmark)

    assert bool(jnp.allclose(out_small, ref_small, atol=1e-2, rtol=1e-2)), (
        out_small, ref_small)
    assert bool(jnp.allclose(out_single, ref_single, atol=1e-2, rtol=1e-2)), (
        out_single, ref_single)
    assert bool(jnp.allclose(out_big, ref_big, atol=1e-2, rtol=1e-2)), (
        out_big, ref_big)

    print("KERNEL_OK")
</pallas_src>

<mosaic_0001>
module attributes {stable_mosaic.version = 11 : i64} {
  func.func @_policy_kernel(%arg0: i32, %arg1: memref<8x3xf32, #tpu.memory_space<vmem>>, %arg2: memref<8x8x4xf32, #tpu.memory_space<vmem>>, %arg3: memref<288x128xf32, #tpu.memory_space<vmem>>, %arg4: memref<8x8xf32, #tpu.memory_space<vmem>>) attributes {dimension_semantics = [#tpu.dimension_semantics<parallel>], iteration_bounds = array<i64: 1>, scalar_prefetch = 0 : i64, scratch_operands = 0 : i64, tpu.core_type = #tpu.core_type<tc>, window_params = [{transform_indices = @transform_0, window_bounds = array<i64: 8, 3>}, {transform_indices = @transform_1, window_bounds = array<i64: 8, 8, 4>}, {pipeline_mode = #tpu.pipeline_mode<synchronous>, transform_indices = @transform_2, window_bounds = array<i64: 288, 128>}, {transform_indices = @transform_3, window_bounds = array<i64: 8, 8>}]} {
    %c0 = arith.constant 0 : index
    %c0_0 = arith.constant 0 : index
    %0 = vector.load %arg3[%c0, %c0_0] : memref<288x128xf32, #tpu.memory_space<vmem>>, vector<3x32xf32>
    %c8 = arith.constant 8 : index
    %c0_1 = arith.constant 0 : index
    %1 = vector.load %arg3[%c8, %c0_1] : memref<288x128xf32, #tpu.memory_space<vmem>>, vector<1x32xf32>
    %c16 = arith.constant 16 : index
    %c0_2 = arith.constant 0 : index
    %2 = vector.load %arg3[%c16, %c0_2] : memref<288x128xf32, #tpu.memory_space<vmem>>, vector<32x32xf32>
    %c48 = arith.constant 48 : index
    %c0_3 = arith.constant 0 : index
    %3 = vector.load %arg3[%c48, %c0_3] : memref<288x128xf32, #tpu.memory_space<vmem>>, vector<1x32xf32>
    %c56 = arith.constant 56 : index
    %c0_4 = arith.constant 0 : index
    %4 = vector.load %arg3[%c56, %c0_4] : memref<288x128xf32, #tpu.memory_space<vmem>>, vector<4x64xf32>
    %c64 = arith.constant 64 : index
    %c0_5 = arith.constant 0 : index
    %5 = vector.load %arg3[%c64, %c0_5] : memref<288x128xf32, #tpu.memory_space<vmem>>, vector<1x64xf32>
    %c72 = arith.constant 72 : index
    %c0_6 = arith.constant 0 : index
    %6 = vector.load %arg3[%c72, %c0_6] : memref<288x128xf32, #tpu.memory_space<vmem>>, vector<64x32xf32>
    %c136 = arith.constant 136 : index
    %c0_7 = arith.constant 0 : index
    %7 = vector.load %arg3[%c136, %c0_7] : memref<288x128xf32, #tpu.memory_space<vmem>>, vector<1x32xf32>
    %c144 = arith.constant 144 : index
    %c0_8 = arith.constant 0 : index
    %8 = vector.load %arg3[%c144, %c0_8] : memref<288x128xf32, #tpu.memory_space<vmem>>, vector<32x64xf32>
    %c176 = arith.constant 176 : index
    %c0_9 = arith.constant 0 : index
    %9 = vector.load %arg3[%c176, %c0_9] : memref<288x128xf32, #tpu.memory_space<vmem>>, vector<32x64xf32>
    %c208 = arith.constant 208 : index
    %c0_10 = arith.constant 0 : index
    %10 = vector.load %arg3[%c208, %c0_10] : memref<288x128xf32, #tpu.memory_space<vmem>>, vector<1x64xf32>
    %c216 = arith.constant 216 : index
    %c0_11 = arith.constant 0 : index
    %11 = vector.load %arg3[%c216, %c0_11] : memref<288x128xf32, #tpu.memory_space<vmem>>, vector<64x8xf32>
    %c280 = arith.constant 280 : index
    %c0_12 = arith.constant 0 : index
    %12 = vector.load %arg3[%c280, %c0_12] : memref<288x128xf32, #tpu.memory_space<vmem>>, vector<1x8xf32>
    %c0_13 = arith.constant 0 : index
    %c0_14 = arith.constant 0 : index
    %13 = vector.load %arg1[%c0_13, %c0_14] : memref<8x3xf32, #tpu.memory_space<vmem>>, vector<8x3xf32>
    %cst = arith.constant dense<0.000000e+00> : vector<8x32xf32>
    %14 = tpu.matmul %13, %0, %cst {dimension_numbers = #tpu.dot_dimension_numbers<[1], [0], [0], [1], [0, 0, 1, 1], [], []>} : vector<8x3xf32>, vector<3x32xf32>, vector<8x32xf32> -> vector<8x32xf32>
    %15 = vector.broadcast %1 : vector<1x32xf32> to vector<8x32xf32>
    %16 = arith.addf %14, %15 : vector<8x32xf32>
    %cst_15 = arith.constant 0.000000e+00 : f32
    %17 = vector.broadcast %cst_15 : f32 to vector<8x32xf32>
    %18 = arith.maximumf %16, %17 : vector<8x32xf32>
    %cst_16 = arith.constant dense<0.000000e+00> : vector<8x32xf32>
    %19 = tpu.matmul %18, %2, %cst_16 {dimension_numbers = #tpu.dot_dimension_numbers<[1], [0], [0], [1], [0, 0, 1, 1], [], []>} : vector<8x32xf32>, vector<32x32xf32>, vector<8x32xf32> -> vector<8x32xf32>
    %20 = vector.broadcast %3 : vector<1x32xf32> to vector<8x32xf32>
    %21 = arith.addf %19, %20 : vector<8x32xf32>
    %cst_17 = arith.constant 0.000000e+00 : f32
    %22 = vector.broadcast %cst_17 : f32 to vector<8x32xf32>
    %23 = arith.maximumf %21, %22 : vector<8x32xf32>
    %c0_18 = arith.constant 0 : index
    %c0_19 = arith.constant 0 : index
    %c0_20 = arith.constant 0 : index
    %24 = vector.load %arg2[%c0_18, %c0_19, %c0_20] : memref<8x8x4xf32, #tpu.memory_space<vmem>>, vector<8x8x4xf32>
    %25 = vector.shape_cast %24 : vector<8x8x4xf32> to vector<64x4xf32>
    %cst_21 = arith.constant dense<0.000000e+00> : vector<64x64xf32>
    %26 = tpu.matmul %25, %4, %cst_21 {dimension_numbers = #tpu.dot_dimension_numbers<[1], [0], [0], [1], [0, 0, 1, 1], [], []>} : vector<64x4xf32>, vector<4x64xf32>, vector<64x64xf32> -> vector<64x64xf32>
    %27 = vector.broadcast %5 : vector<1x64xf32> to vector<64x64xf32>
    %28 = arith.addf %26, %27 : vector<64x64xf32>
    %cst_22 = arith.constant 0.000000e+00 : f32
    %29 = vector.broadcast %cst_22 : f32 to vector<64x64xf32>
    %30 = arith.maximumf %28, %29 : vector<64x64xf32>
    %cst_23 = arith.constant dense<0.000000e+00> : vector<64x32xf32>
    %31 = tpu.matmul %30, %6, %cst_23 {dimension_numbers = #tpu.dot_dimension_numbers<[1], [0], [0], [1], [0, 0, 1, 1], [], []>} : vector<64x64xf32>, vector<64x32xf32>, vector<64x32xf32> -> vector<64x32xf32>
    %32 = vector.broadcast %7 : vector<1x32xf32> to vector<64x32xf32>
    %33 = arith.addf %31, %32 : vector<64x32xf32>
    %cst_24 = arith.constant 0.000000e+00 : f32
    %34 = vector.broadcast %cst_24 : f32 to vector<64x32xf32>
    %35 = arith.maximumf %33, %34 : vector<64x32xf32>
    %36 = vector.extract_strided_slice %35 {offsets = [0, 0], sizes = [8, 32], strides = [1, 1]} : vector<64x32xf32> to vector<8x32xf32>
    %37 = arith.mulf %23, %36 : vector<8x32xf32>
    %cst_25 = arith.constant dense<0.000000e+00> : vector<8xf32>
    %38 = vector.multi_reduction <add>, %37, %cst_25 [1] : vector<8x32xf32> to vector<8xf32>
    %39 = vector.shape_cast %38 : vector<8xf32> to vector<8x1xf32>
    %40 = vector.extract_strided_slice %35 {offsets = [8, 0], sizes = [8, 32], strides = [1, 1]} : vector<64x32xf32> to vector<8x32xf32>
    %41 = arith.mulf %23, %40 : vector<8x32xf32>
    %cst_26 = arith.constant dense<0.000000e+00> : vector<8xf32>
    %42 = vector.multi_reduction <add>, %41, %cst_26 [1] : vector<8x32xf32> to vector<8xf32>
    %43 = vector.shape_cast %42 : vector<8xf32> to vector<8x1xf32>
    %44 = vector.extract_strided_slice %35 {offsets = [16, 0], sizes = [8, 32], strides = [1, 1]} : vector<64x32xf32> to vector<8x32xf32>
    %45 = arith.mulf %23, %44 : vector<8x32xf32>
    %cst_27 = arith.constant dense<0.000000e+00> : vector<8xf32>
    %46 = vector.multi_reduction <add>, %45, %cst_27 [1] : vector<8x32xf32> to vector<8xf32>
    %47 = vector.shape_cast %46 : vector<8xf32> to vector<8x1xf32>
    %48 = vector.extract_strided_slice %35 {offsets = [24, 0], sizes = [8, 32], strides = [1, 1]} : vector<64x32xf32> to vector<8x32xf32>
    %49 = arith.mulf %23, %48 : vector<8x32xf32>
    %cst_28 = arith.constant dense<0.000000e+00> : vector<8xf32>
    %50 = vector.multi_reduction <add>, %49, %cst_28 [1] : vector<8x32xf32> to vector<8xf32>
    %51 = vector.shape_cast %50 : vector<8xf32> to vector<8x1xf32>
    %52 = vector.extract_strided_slice %35 {offsets = [32, 0], sizes = [8, 32], strides = [1, 1]} : vector<64x32xf32> to vector<8x32xf32>
    %53 = arith.mulf %23, %52 : vector<8x32xf32>
    %cst_29 = arith.constant dense<0.000000e+00> : vector<8xf32>
    %54 = vector.multi_reduction <add>, %53, %cst_29 [1] : vector<8x32xf32> to vector<8xf32>
    %55 = vector.shape_cast %54 : vector<8xf32> to vector<8x1xf32>
    %56 = vector.extract_strided_slice %35 {offsets = [40, 0], sizes = [8, 32], strides = [1, 1]} : vector<64x32xf32> to vector<8x32xf32>
    %57 = arith.mulf %23, %56 : vector<8x32xf32>
    %cst_30 = arith.constant dense<0.000000e+00> : vector<8xf32>
    %58 = vector.multi_reduction <add>, %57, %cst_30 [1] : vector<8x32xf32> to vector<8xf32>
    %59 = vector.shape_cast %58 : vector<8xf32> to vector<8x1xf32>
    %60 = vector.extract_strided_slice %35 {offsets = [48, 0], sizes = [8, 32], strides = [1, 1]} : vector<64x32xf32> to vector<8x32xf32>
    %61 = arith.mulf %23, %60 : vector<8x32xf32>
    %cst_31 = arith.constant dense<0.000000e+00> : vector<8xf32>
    %62 = vector.multi_reduction <add>, %61, %cst_31 [1] : vector<8x32xf32> to vector<8xf32>
    %63 = vector.shape_cast %62 : vector<8xf32> to vector<8x1xf32>
    %64 = vector.extract_strided_slice %35 {offsets = [56, 0], sizes = [8, 32], strides = [1, 1]} : vector<64x32xf32> to vector<8x32xf32>
    %65 = arith.mulf %23, %64 : vector<8x32xf32>
    %cst_32 = arith.constant dense<0.000000e+00> : vector<8xf32>
    %66 = vector.multi_reduction <add>, %65, %cst_32 [1] : vector<8x32xf32> to vector<8xf32>
    %67 = vector.shape_cast %66 : vector<8xf32> to vector<8x1xf32>
    %68 = tpu.concatenate %39, %43, %47, %51, %55, %59, %63, %67 in 1 : vector<8x1xf32>, vector<8x1xf32>, vector<8x1xf32>, vector<8x1xf32>, vector<8x1xf32>, vector<8x1xf32>, vector<8x1xf32>, vector<8x1xf32> -> vector<8x8xf32>
    %cst_33 = arith.constant 2.500000e-01 : f32
    %69 = vector.broadcast %cst_33 : f32 to vector<8x8xf32>
    %70 = arith.mulf %68, %69 : vector<8x8xf32>
    %cst_34 = arith.constant dense<0xFF800000> : vector<8xf32>
    %71 = vector.multi_reduction <maximumf>, %70, %cst_34 [1] : vector<8x8xf32> to vector<8xf32>
    %72 = vector.shape_cast %71 : vector<8xf32> to vector<8x1xf32>
    %73 = vector.broadcast %72 : vector<8x1xf32> to vector<8x8xf32>
    %74 = arith.subf %70, %73 : vector<8x8xf32>
    %75 = math.exp %74 : vector<8x8xf32>
    %cst_35 = arith.constant dense<0.000000e+00> : vector<8xf32>
    %76 = vector.multi_reduction <add>, %75, %cst_35 [1] : vector<8x8xf32> to vector<8xf32>
    %77 = vector.shape_cast %76 : vector<8xf32> to vector<8x1xf32>
    %78 = tpu.reciprocal %77 {approx = true} : vector<8x1xf32> -> vector<8x1xf32>
    %79 = vector.broadcast %78 : vector<8x1xf32> to vector<8x8xf32>
    %80 = arith.mulf %75, %79 : vector<8x8xf32>
    %81 = vector.extract_strided_slice %80 {offsets = [0, 0], sizes = [8, 1], strides = [1, 1]} : vector<8x8xf32> to vector<8x1xf32>
    %82 = vector.extract_strided_slice %35 {offsets = [0, 0], sizes = [8, 32], strides = [1, 1]} : vector<64x32xf32> to vector<8x32xf32>
    %83 = vector.broadcast %81 : vector<8x1xf32> to vector<8x32xf32>
    %84 = arith.mulf %83, %82 : vector<8x32xf32>
    %85 = vector.extract_strided_slice %80 {offsets = [0, 1], sizes = [8, 1], strides = [1, 1]} : vector<8x8xf32> to vector<8x1xf32>
    %86 = vector.extract_strided_slice %35 {offsets = [8, 0], sizes = [8, 32], strides = [1, 1]} : vector<64x32xf32> to vector<8x32xf32>
    %87 = vector.broadcast %85 : vector<8x1xf32> to vector<8x32xf32>
    %88 = arith.mulf %87, %86 : vector<8x32xf32>
    %89 = arith.addf %84, %88 : vector<8x32xf32>
    %90 = vector.extract_strided_slice %80 {offsets = [0, 2], sizes = [8, 1], strides = [1, 1]} : vector<8x8xf32> to vector<8x1xf32>
    %91 = vector.extract_strided_slice %35 {offsets = [16, 0], sizes = [8, 32], strides = [1, 1]} : vector<64x32xf32> to vector<8x32xf32>
    %92 = vector.broadcast %90 : vector<8x1xf32> to vector<8x32xf32>
    %93 = arith.mulf %92, %91 : vector<8x32xf32>
    %94 = arith.addf %89, %93 : vector<8x32xf32>
    %95 = vector.extract_strided_slice %80 {offsets = [0, 3], sizes = [8, 1], strides = [1, 1]} : vector<8x8xf32> to vector<8x1xf32>
    %96 = vector.extract_strided_slice %35 {offsets = [24, 0], sizes = [8, 32], strides = [1, 1]} : vector<64x32xf32> to vector<8x32xf32>
    %97 = vector.broadcast %95 : vector<8x1xf32> to vector<8x32xf32>
    %98 = arith.mulf %97, %96 : vector<8x32xf32>
    %99 = arith.addf %94, %98 : vector<8x32xf32>
    %100 = vector.extract_strided_slice %80 {offsets = [0, 4], sizes = [8, 1], strides = [1, 1]} : vector<8x8xf32> to vector<8x1xf32>
    %101 = vector.extract_strided_slice %35 {offsets = [32, 0], sizes = [8, 32], strides = [1, 1]} : vector<64x32xf32> to vector<8x32xf32>
    %102 = vector.broadcast %100 : vector<8x1xf32> to vector<8x32xf32>
    %103 = arith.mulf %102, %101 : vector<8x32xf32>
    %104 = arith.addf %99, %103 : vector<8x32xf32>
    %105 = vector.extract_strided_slice %80 {offsets = [0, 5], sizes = [8, 1], strides = [1, 1]} : vector<8x8xf32> to vector<8x1xf32>
    %106 = vector.extract_strided_slice %35 {offsets = [40, 0], sizes = [8, 32], strides = [1, 1]} : vector<64x32xf32> to vector<8x32xf32>
    %107 = vector.broadcast %105 : vector<8x1xf32> to vector<8x32xf32>
    %108 = arith.mulf %107, %106 : vector<8x32xf32>
    %109 = arith.addf %104, %108 : vector<8x32xf32>
    %110 = vector.extract_strided_slice %80 {offsets = [0, 6], sizes = [8, 1], strides = [1, 1]} : vector<8x8xf32> to vector<8x1xf32>
    %111 = vector.extract_strided_slice %35 {offsets = [48, 0], sizes = [8, 32], strides = [1, 1]} : vector<64x32xf32> to vector<8x32xf32>
    %112 = vector.broadcast %110 : vector<8x1xf32> to vector<8x32xf32>
    %113 = arith.mulf %112, %111 : vector<8x32xf32>
    %114 = arith.addf %109, %113 : vector<8x32xf32>
    %115 = vector.extract_strided_slice %80 {offsets = [0, 7], sizes = [8, 1], strides = [1, 1]} : vector<8x8xf32> to vector<8x1xf32>
    %116 = vector.extract_strided_slice %35 {offsets = [56, 0], sizes = [8, 32], strides = [1, 1]} : vector<64x32xf32> to vector<8x32xf32>
    %117 = vector.broadcast %115 : vector<8x1xf32> to vector<8x32xf32>
    %118 = arith.mulf %117, %116 : vector<8x32xf32>
    %119 = arith.addf %114, %118 : vector<8x32xf32>
    %cst_36 = arith.constant dense<0.000000e+00> : vector<8x64xf32>
    %120 = tpu.matmul %23, %8, %cst_36 {dimension_numbers = #tpu.dot_dimension_numbers<[1], [0], [0], [1], [0, 0, 1, 1], [], []>} : vector<8x32xf32>, vector<32x64xf32>, vector<8x64xf32> -> vector<8x64xf32>
    %cst_37 = arith.constant dense<0.000000e+00> : vector<8x64xf32>
    %121 = tpu.matmul %119, %9, %cst_37 {dimension_numbers = #tpu.dot_dimension_numbers<[1], [0], [0], [1], [0, 0, 1, 1], [], []>} : vector<8x32xf32>, vector<32x64xf32>, vector<8x64xf32> -> vector<8x64xf32>
    %122 = arith.addf %120, %121 : vector<8x64xf32>
    %123 = vector.broadcast %10 : vector<1x64xf32> to vector<8x64xf32>
    %124 = arith.addf %122, %123 : vector<8x64xf32>
    %cst_38 = arith.constant 0.000000e+00 : f32
    %125 = vector.broadcast %cst_38 : f32 to vector<8x64xf32>
    %126 = arith.maximumf %124, %125 : vector<8x64xf32>
    %cst_39 = arith.constant dense<0.000000e+00> : vector<8x8xf32>
    %127 = tpu.matmul %126, %11, %cst_39 {dimension_numbers = #tpu.dot_dimension_numbers<[1], [0], [0], [1], [0, 0, 1, 1], [], []>} : vector<8x64xf32>, vector<64x8xf32>, vector<8x8xf32> -> vector<8x8xf32>
    %128 = vector.broadcast %12 : vector<1x8xf32> to vector<8x8xf32>
    %129 = arith.addf %127, %128 : vector<8x8xf32>
    %130 = math.tanh %129 : vector<8x8xf32>
    %c0_40 = arith.constant 0 : index
    %c0_41 = arith.constant 0 : index
    %131 = vector.load %arg4[%c0_40, %c0_41] : memref<8x8xf32, #tpu.memory_space<vmem>>, vector<8x8xf32>
    tpu.vector_store %arg4[%c0_40, %c0_41], %130 {strides = array<i32>} : memref<8x8xf32, #tpu.memory_space<vmem>>, vector<8x8xf32>,
    return
  }
  func.func @transform_0(%arg0: i32) -> (i32, i32) {
    %c0_i32 = arith.constant 0 : i32
    %c0_i32_0 = arith.constant 0 : i32
    return %arg0, %c0_i32 : i32, i32
  }
  func.func @transform_1(%arg0: i32) -> (i32, i32, i32) {
    %c0_i32 = arith.constant 0 : i32
    %c0_i32_0 = arith.constant 0 : i32
    %c0_i32_1 = arith.constant 0 : i32
    return %c0_i32, %arg0, %c0_i32_0 : i32, i32, i32
  }
  func.func @transform_2(%arg0: i32) -> (i32, i32) {
    %c0_i32 = arith.constant 0 : i32
    %c0_i32_0 = arith.constant 0 : i32
    %c0_i32_1 = arith.constant 0 : i32
    return %c0_i32, %c0_i32_0 : i32, i32
  }
  func.func @transform_3(%arg0: i32) -> (i32, i32) {
    %c0_i32 = arith.constant 0 : i32
    %c0_i32_0 = arith.constant 0 : i32
    return %arg0, %c0_i32 : i32, i32
  }
}

</mosaic_0001>

<bundles_post_ra>
// kernel: policy_net_forward.1
= control target key start
LH: loop header
LB: loop body
LE: loop exit
PB: predicated region body
PF: predicated region fallthrough
CT: control target
= control target key end

     0   :  { %vm56_vm0 = vcmask 1042432   ;;  %vm141_vm1 = vcmask 1043456   ;;  %vm52_vm2 = vcmask 23552   ;;  %vm116_vm3 = vcmask 31744   ;;  %s770_s2 = inlined_call_operand.vmem [shape: f32[288,128], index: 2, kind: input, shape index: {}]   ;;  %s771_s0 = inlined_call_operand.vmem [shape: f32[8,3], index: 0, kind: input, shape index: {}]   ;;  %s772_s1 = inlined_call_operand.vmem [shape: f32[8,8,4], index: 1, kind: input, shape index: {}]   ;;  %s773_s3 = inlined_call_operand.vmem [shape: f32[8,8], index: 3, kind: output, shape index: {}]  }
   0x1   :  { %v14_v0 = vld [vmem:[%s770_s2] sm:$0x7]  ;;  %v21_v1 = vld [vmem:[%s770_s2 + $0x38] sm:$0xf]  ;;  %v108_v3 = vld [vmem:[%s772_s1 + $0x8] sm:$0xff]  ;;  %vm82_vm4 = vcmask 261120  }
   0x2   :  { %v50_v2 = vld [vmem:[%s771_s0] sm:$0xff]  ;;  %453 = vmatpush.msk.msra.mxu0 %vm56_vm0, %v14_v0  ;;  %476 = vmatpush.msk.msra.mxu2 %vm141_vm1, %v21_v1  ;;  %v109_v5 = vld [vmem:[%s772_s1 + $0x10] sm:$0xff]  ;;  %v110_v6 = vld [vmem:[%s772_s1 + $0x18] sm:$0xff]  ;;  %vm195_vm5 = vcmask 523264   ;;  %vm301_vm6 = vcmask 7168   ;;  %vm303_vm7 = vcmask 15360  }
   0x3   :  { %454 = vmatmul.msk.f32.vlgmr.msra.gmra.mxu0 %vm52_vm2, %v50_v2  ;;  %458 = vmatmul.msk.f32.vlgmr.msra.gmra.mxu2 %vm116_vm3, %v108_v3  ;;  %v107_v4 = vld [vmem:[%s772_s1] sm:$0xff]  ;;  %v19_v7 = vld [vmem:[%s770_s2 + $0x28] sm:$0xff]  ;;  %v17_v10 = vld [vmem:[%s770_s2 + $0x18] sm:$0xff]  ;;  %vm307_vm8 = vcmask 39936   ;;  %vm309_vm9 = vcmask 48128   ;;  %vm311_vm10 = vcmask 56320  }
   0x4   :  { %456 = vmatpush.msk.msrb.mxu0 %vm141_vm1, %v21_v1  ;;  %v18_v8 = vld [vmem:[%s770_s2 + $0x20] sm:$0xff]  ;;  %98 = vmatpush.msra.mxu1 %v19_v7  ;;  %v16_v11 = vld [vmem:[%s770_s2 + $0x10] sm:$0xff]  ;;  %v112_v13 = vld [vmem:[%s772_s1 + $0x28] sm:$0xff]  ;;  %vm314_vm11 = vcmask 64512  }
   0x5   :  { %v30_v9 = vld [vmem:[%s770_s2 + $0x80] sm:$0xff]  ;;  %v113_v14 = vld [vmem:[%s772_s1 + $0x30] sm:$0xff]  ;;  %v114_v15 = vld [vmem:[%s772_s1 + $0x38] sm:$0xff] }
   0x6   :  { %477 = vmatpush.msra.mxu3 %v30_v9  ;;  %99 = vmatpush.msra.mxu1 %v18_v8  ;;  %v111_v12 = vld [vmem:[%s772_s1 + $0x20] sm:$0xff]  ;;  %v29_v16 = vld [vmem:[%s770_s2 + $0x78] sm:$0xff]  ;;  %v28_v17 = vld [vmem:[%s770_s2 + $0x70] sm:$0xff] }
   0x7   :  { %v27_v18 = vld [vmem:[%s770_s2 + $0x68] sm:$0xff]  ;;  %v26_v19 = vld [vmem:[%s770_s2 + $0x60] sm:$0xff]  ;;  %v25_v20 = vld [vmem:[%s770_s2 + $0x58] sm:$0xff] }
   0x8   :  { %100 = vmatpush.msra.mxu1 %v17_v10  ;;  %478 = vmatpush.msra.mxu3 %v29_v16  ;;  %v24_v21 = vld [vmem:[%s770_s2 + $0x50] sm:$0xff]  ;;  %v23_v22 = vld [vmem:[%s770_s2 + $0x48] sm:$0xff]  ;;  %v503_v28 = vld [vmem:[%s770_s2 + $0x40] ss:$0 sm:$0xff] }
   0x9   :  { %v502_v23 = vld [vmem:[%s770_s2 + $0x8] ss:$0 sm:$0xff]  ;;  %v34_v53 = vld [vmem:[%s770_s2 + $0xa0] sm:$0xff]  ;;  %v33_v54 = vld [vmem:[%s770_s2 + $0x98] sm:$0xff] }
   0xa   :  { %101 = vmatpush.msra.mxu1 %v16_v11  ;;  %479 = vmatpush.msra.mxu3 %v28_v17  ;;  %v35_v52 = vld [vmem:[%s770_s2 + $0xa8] sm:$0xff]  ;;  %v32_v55 = vld [vmem:[%s770_s2 + $0x90] sm:$0xff] }
   0xb   :  { %457 = vmatmul.msk.f32.vlgmr.msrb.gmra.mxu0 %vm116_vm3, %v107_v4  ;;  %459 = vmatmul.msk.f32.gmra.mxu2 %vm116_vm3, %v109_v5  ;;  %v504_v56 = vld [vmem:[%s770_s2 + $0x30] ss:$0 sm:$0xff]  ;;  %v505_v60 = vld [vmem:[%s770_s2 + $0x88] ss:$0 sm:$0xff] }
   0xc   :  { %228 = vmatpush.msrb.mxu1 %v30_v9  ;;  %480 = vmatpush.msra.mxu3 %v27_v18 }
   0xe   :  { %229 = vmatpush.msrb.mxu1 %v29_v16  ;;  %481 = vmatpush.msra.mxu3 %v26_v19 }
  0x10   :  { %230 = vmatpush.msrb.mxu1 %v28_v17  ;;  %482 = vmatpush.msra.mxu3 %v25_v20 }
  0x12   :  { %231 = vmatpush.msrb.mxu1 %v27_v18  ;;  %483 = vmatpush.msra.mxu3 %v24_v21 }
  0x13   :  { %460 = vmatmul.msk.f32.gmra.mxu2 %vm116_vm3, %v110_v6 }
  0x14   :  { %232 = vmatpush.msrb.mxu1 %v26_v19  ;;  %484 = vmatpush.msra.mxu3 %v23_v22 }
  0x16   :  { %233 = vmatpush.msrb.mxu1 %v25_v20 }
  0x18   :  { %234 = vmatpush.msrb.mxu1 %v24_v21 }
  0x1a   :  { %235 = vmatpush.msrb.mxu1 %v23_v22 }
  0x1b   :  { %461 = vmatmul.msk.f32.gmra.mxu2 %vm116_vm3, %v111_v12 }
  0x23   :  { %462 = vmatmul.msk.f32.gmra.mxu2 %vm116_vm3, %v112_v13 }
  0x2b   :  { %463 = vmatmul.msk.f32.gmra.mxu2 %vm116_vm3, %v113_v14 }
  0x33   :  { %464 = vmatmul.msk.f32.gmra.mxu2 %vm116_vm3, %v114_v15 }
  0x80   :  { %v77_v24 = vpop.f32.mrf.mxu0 }
  0x81   :  { %v78_v25 = vadd.f32 %v502_v23, %v77_v24 }
  0x83   :  { %v80_v26 = vmax.f32 %v78_v25, 0.0 }
  0x85   :  { %455 = vmatmul.msk.f32.vlgmr.msra.gmra.mxu1 %vm82_vm4, %v80_v26 }
  0x86   :  { %v165_v27 = vpop.f32.mrf.mxu2  ;;  %412 = vmatpush.msra.mxu1 %v35_v52 }
  0x87   :  { %v166_v33 = vadd.f32 %v503_v28, %v165_v27 }
  0x88   :  { %v162_v29 = vpop.f32.mrf.mxu0  ;;  %413 = vmatpush.msra.mxu1 %v34_v53 }
  0x89   :  { %v163_v30 = vadd.f32 %v503_v28, %v162_v29  ;;  %v187_v34 = vmax.f32 %v166_v33, 0.0 }
  0x8a   :  { %414 = vmatpush.msra.mxu1 %v33_v54 }
  0x8b   :  { %v186_v31 = vmax.f32 %v163_v30, 0.0 }
  0x8c   :  { %415 = vmatpush.msra.mxu1 %v32_v55 }
  0x8d   :  { %465 = vmatmul.msk.f32.vlgmr.msrb.gmra.mxu1 %vm195_vm5, %v186_v31 }
  0x8e   :  { %v168_v32 = vpop.f32.mrf.mxu2 }
  0x8f   :  { %v169_v36 = vadd.f32 %v503_v28, %v168_v32 }
  0x91   :  { %v188_v39 = vmax.f32 %v169_v36, 0.0 }
  0x95   :  { %466 = vmatmul.msk.f32.gmra.mxu1 %vm195_vm5, %v187_v34 }
  0x96   :  { %v171_v35 = vpop.f32.mrf.mxu2 }
  0x97   :  { %v172_v37 = vadd.f32 %v503_v28, %v171_v35 }
  0x99   :  { %v189_v38 = vmax.f32 %v172_v37, 0.0 }
  0x9b   :  { %468 = vmatmul.msk.f32.vlgmr.msra.gmra.mxu3 %vm195_vm5, %v189_v38 }
  0x9d   :  { %467 = vmatmul.msk.f32.gmra.mxu1 %vm195_vm5, %v188_v39 }
  0x9e   :  { %v174_v40 = vpop.f32.mrf.mxu2 }
  0x9f   :  { %v175_v41 = vadd.f32 %v503_v28, %v174_v40 }
  0xa1   :  { %v190_v42 = vmax.f32 %v175_v41, 0.0 }
  0xa3   :  { %469 = vmatmul.msk.f32.gmra.mxu3 %vm195_vm5, %v190_v42 }
  0xa6   :  { %v177_v43 = vpop.f32.mrf.mxu2 }
  0xa7   :  { %v178_v44 = vadd.f32 %v503_v28, %v177_v43 }
  0xa9   :  { %v191_v45 = vmax.f32 %v178_v44, 0.0 }
  0xab   :  { %470 = vmatmul.msk.f32.gmra.mxu3 %vm195_vm5, %v191_v45 }
  0xae   :  { %v180_v46 = vpop.f32.mrf.mxu2 }
  0xaf   :  { %v181_v47 = vadd.f32 %v503_v28, %v180_v46 }
  0xb1   :  { %v192_v48 = vmax.f32 %v181_v47, 0.0 }
  0xb3   :  { %471 = vmatmul.msk.f32.gmra.mxu3 %vm195_vm5, %v192_v48 }
  0xb6   :  { %v183_v49 = vpop.f32.mrf.mxu2 }
  0xb7   :  { %v184_v50 = vadd.f32 %v503_v28, %v183_v49 }
  0xb9   :  { %v193_v51 = vmax.f32 %v184_v50, 0.0 }
  0xbb   :  { %472 = vmatmul.msk.f32.gmra.mxu3 %vm195_vm5, %v193_v51 }
 0x102   :  { %v103_v57 = vpop.f32.mrf.mxu1 }
 0x103   :  { %v104_v58 = vadd.f32 %v504_v56, %v103_v57 }
 0x105   :  { %v106_v59 = vmax.f32 %v104_v58, 0.0 }
 0x107   :  { %474 = vmatmul.msk.f32.vlgmr.msra.gmra.mxu1 %vm82_vm4, %v106_v59 }
 0x10a   :  { %v237_v61 = vpop.f32.mrf.mxu1 }
 0x10b   :  { %v654_v62 = vadd.f32 %v505_v60, %v237_v61  ;;  %v516_v61 = vmov 0  }
 0x10c   :  { %493 = vset.pattern.permute.xlu1 %v516_v61 }
 0x10d   :  { %v261_v63 = vmax.f32 %v654_v62, 0.0 }
 0x10f   :  { %v269_v0 = vmul.f32 %v261_v63, %v106_v59 }
 0x111   :  { %v270_v1 = vsel %vm82_vm4, %v269_v0, 0.0 }
 0x112   :  { %v240_v2 = vpop.f32.mrf.mxu1  ;;  %271 = vadd.xlane.f32.xlu0 %v270_v1 }
 0x113   :  { %v660_v3 = vadd.f32 %v505_v60, %v240_v2 }
 0x115   :  { %v262_v4 = vmax.f32 %v660_v3, 0.0 }
 0x117   :  { %v273_v5 = vmul.f32 %v262_v4, %v106_v59 }
 0x119   :  { %v274_v6 = vsel %vm82_vm4, %v273_v5, 0.0  ;;  %v517_v5 = vmov 3  }
 0x11a   :  { %v243_v7 = vpop.f32.mrf.mxu1  ;;  %275 = vadd.xlane.f32.xlu0 %v274_v6  ;;  %v518_v6 = vmov 7  }
 0x11b   :  { %v666_v8 = vadd.f32 %v505_v60, %v243_v7  ;;  %v519_v7 = vmov 4  }
 0x11d   :  { %v263_v9 = vmax.f32 %v666_v8, 0.0 }
 0x11e   :  { %v246_v10 = vpop.f32.mrf.mxu3 }
 0x11f   :  { %v669_v11 = vadd.f32 %v505_v60, %v246_v10  ;;  %v277_v12 = vmul.f32 %v263_v9, %v106_v59  ;;  %v520_v10 = vmov 5  }
 0x121   :  { %v264_v13 = vmax.f32 %v669_v11, 0.0  ;;  %v278_v14 = vsel %vm82_vm4, %v277_v12, 0.0  ;;  %v521_v12 = vmov 6  }
 0x122   :  { %279 = vadd.xlane.f32.xlu1 %v278_v14  ;;  %v39_v14 = vld [vmem:[%s770_s2 + $0xc8] sm:$0xff] }
 0x123   :  { %v281_v15 = vmul.f32 %v264_v13, %v106_v59  ;;  %389 = vmatpush.msra.mxu0 %v39_v14 }
 0x125   :  { %v282_v19 = vsel %vm82_vm4, %v281_v15, 0.0  ;;  %v38_v15 = vld [vmem:[%s770_s2 + $0xc0] sm:$0xff] }
 0x126   :  { %v249_v16 = vpop.f32.mrf.mxu3  ;;  %390 = vmatpush.msra.mxu0 %v38_v15 }
 0x127   :  { %v677_v17 = vadd.f32 %v505_v60, %v249_v16 }
 0x129   :  { %v265_v18 = vmax.f32 %v677_v17, 0.0  ;;  %v43_v17 = vld [vmem:[%s770_s2 + $0xe8] sm:$0xff] }
 0x12a   :  { %283 = vadd.xlane.f32.xlu1 %v282_v19  ;;  %v37_v19 = vld [vmem:[%s770_s2 + $0xb8] sm:$0xff] }
 0x12b   :  { %v285_v20 = vmul.f32 %v265_v18, %v106_v59  ;;  %391 = vmatpush.msra.mxu0 %v37_v19 }
 0x12d   :  { %v286_v21 = vsel %vm82_vm4, %v285_v20, 0.0  ;;  %v36_v20 = vld [vmem:[%s770_s2 + $0xb0] sm:$0xff] }
 0x12e   :  { %v252_v22 = vpop.f32.mrf.mxu3  ;;  %287 = vadd.xlane.f32.xlu2 %v286_v21  ;;  %392 = vmatpush.msra.mxu0 %v36_v20  ;;  %v48_v21 = vld [vmem:[%s770_s2 + $0x110] sm:$0xff] }
 0x12f   :  { %v684_v23 = vadd.f32 %v505_v60, %v252_v22  ;;  %v47_v22 = vld [vmem:[%s770_s2 + $0x108] sm:$0xff] }
 0x130   :  { %435 = vmatpush.msrb.mxu0 %v48_v21 }
 0x131   :  { %v266_v24 = vmax.f32 %v684_v23, 0.0  ;;  %v41_v23 = vld [vmem:[%s770_s2 + $0xd8] sm:$0xff] }
 0x132   :  { %436 = vmatpush.msrb.mxu0 %v47_v22 }
 0x133   :  { %v289_v25 = vmul.f32 %v266_v24, %v106_v59 }
 0x135   :  { %v290_v26 = vsel %vm82_vm4, %v289_v25, 0.0  ;;  %v46_v25 = vld [vmem:[%s770_s2 + $0x100] sm:$0xff] }
 0x136   :  { %v255_v27 = vpop.f32.mrf.mxu3  ;;  %291 = vadd.xlane.f32.xlu2 %v290_v26  ;;  %v45_v26 = vld [vmem:[%s770_s2 + $0xf8] sm:$0xff]  ;;  %437 = vmatpush.msrb.mxu0 %v46_v25 }
 0x137   :  { %v690_v28 = vadd.f32 %v505_v60, %v255_v27 }
 0x138   :  { %438 = vmatpush.msrb.mxu0 %v45_v26 }
 0x139   :  { %v267_v29 = vmax.f32 %v690_v28, 0.0 }
 0x13b   :  { %v293_v30 = vmul.f32 %v267_v29, %v106_v59 }
 0x13d   :  { %v294_v31 = vsel %vm82_vm4, %v293_v30, 0.0 }
 0x13e   :  { %v258_v32 = vpop.f32.mrf.mxu3  ;;  %295 = vadd.xlane.f32.xlu0 %v294_v31 }
 0x13f   :  { %v696_v33 = vadd.f32 %v505_v60, %v258_v32  ;;  %v515_v60 = vmov 1  }
 0x140   :  { %494 = vset.pattern.permute.xlu2 %v515_v60 }
 0x141   :  { %v268_v34 = vmax.f32 %v696_v33, 0.0 }
 0x143   :  { %v297_v35 = vmul.f32 %v268_v34, %v106_v59  ;;  %v514_v59 = vmov 2  }
 0x144   :  { %495 = vset.pattern.permute.xlu0 %v514_v59 }
 0x145   :  { %v298_v36 = vsel %vm82_vm4, %v297_v35, 0.0 }
 0x146   :  { %299 = vadd.xlane.f32.xlu1 %v298_v36 }
 0x184   :  { %v417_v28 = vpop.f32.mrf.mxu1 }
 0x185   :  { %v272_v37 = vpop.xlane.xlu0 %271 }
 0x18d   :  { %v276_v40 = vpop.xlane.xlu0 %275 }
 0x18e   :  { %v302_v42 = vsel %vm301_vm6, %v272_v37, %v276_v40 }
 0x195   :  { %v280_v38 = vpop.xlane.xlu1 %279 }
 0x196   :  { %v304_v43 = vsel %vm303_vm7, %v302_v42, %v280_v38 }
 0x19d   :  { %v284_v41 = vpop.xlane.xlu1 %283 }
 0x19e   :  { %v305_v45 = vsel %vm52_vm2, %v304_v43, %v284_v41 }
 0x1a1   :  { %v288_v39 = vpop.xlane.xlu2 %287 }
 0x1a2   :  { %v306_v47 = vsel %vm116_vm3, %v305_v45, %v288_v39 }
 0x1a9   :  { %v292_v44 = vpop.xlane.xlu2 %291 }
 0x1aa   :  { %v308_v48 = vsel %vm307_vm8, %v306_v47, %v292_v44  ;;  %v507_v47 = vld [vmem:[%s770_s2 + $0x118] ss:$0 sm:$0xff] }
 0x1b1   :  { %v296_v46 = vpop.xlane.xlu0 %295 }
 0x1b2   :  { %v310_v49 = vsel %vm309_vm9, %v308_v48, %v296_v46 }
 0x1b9   :  { %v300_v50 = vpop.xlane.xlu1 %299 }
 0x1ba   :  { %v312_v51 = vsel %vm311_vm10, %v310_v49, %v300_v50 }
 0x1bb   :  { %v313_v52 = vmul.f32 0.25, %v312_v51 }
 0x1bd   :  { %v315_v53 = vsel %vm314_vm11, %v313_v52, -inf }
 0x1be   :  { %316 = vmax.xlane.f32.xlu2 %v315_v53 }
 0x231   :  { %v317_v54 = vpop.xlane.xlu2 %316 }
 0x232   :  { %v318_v55 = vsub.f32 %v313_v52, %v317_v54 }
 0x234   :  { %v319_v56 = vmul.f32 1.442695, %v318_v55 }
 0x236   :  { %508 = vpow2.f32 %v319_v56 }
 0x23c   :  { %v509_v57 = vpop.eup %508 }
 0x23d   :  { %v321_v58 = vsel %vm314_vm11, %v509_v57, 0.0 }
 0x23e   :  { %322 = vadd.xlane.f32.xlu0 %v321_v58 }
 0x2b1   :  { %v323_v0 = vpop.xlane.xlu0 %322 }
 0x2b2   :  { %510 = vrcp.f32 %v323_v0 }
 0x2b8   :  { %v511_v1 = vpop.eup %510 }
 0x2b9   :  { %v325_v2 = vmul.f32 %v511_v1, %v509_v57 }
 0x2bb   :  { %339 = vperm.xlu0 %495, %v325_v2   ;;  %333 = vperm.xlu2 %494, %v325_v2  }
 0x2bc   :  { %328 = vperm.xlu1 %493, %v325_v2  }
 0x2c3   :  { %496 = vset.pattern.permute.xlu2 %v517_v5  ;;  %501 = vset.pattern.permute.xlu0 %v518_v6 }
 0x2c4   :  { %497 = vset.pattern.permute.xlu1 %v519_v7  ;;  %345 = vperm.xlu2 %496, %v325_v2  }
 0x2c5   :  { %351 = vperm.xlu1 %497, %v325_v2  }
 0x2cc   :  { %498 = vset.pattern.permute.xlu2 %v520_v10 }
 0x2cd   :  { %499 = vset.pattern.permute.xlu1 %v521_v12  ;;  %357 = vperm.xlu2 %498, %v325_v2  }
 0x2ce   :  { %363 = vperm.xlu1 %499, %v325_v2  }
 0x2d5   :  { %500 = vset.pattern.permute.xlu2 %v518_v6 }
 0x2d6   :  { %369 = vperm.xlu2 %500, %v325_v2  }
 0x315   :  { %v334_v16 = vpop.permute.xlu2 %333 }
 0x316   :  { %v336_v32 = vmul.f32 %v334_v16, %v262_v4 }
 0x31e   :  { %v346_v27 = vpop.permute.xlu2 %345 }
 0x31f   :  { %v348_v41 = vmul.f32 %v346_v27, %v264_v13  ;;  %v44_v13 = vld [vmem:[%s770_s2 + $0xf0] sm:$0xff] }
 0x320   :  { %439 = vmatpush.msrb.mxu0 %v44_v13 }
 0x322   :  { %440 = vmatpush.msrb.mxu0 %v43_v17 }
 0x327   :  { %v358_v38 = vpop.permute.xlu2 %357 }
 0x32d   :  { %v340_v35 = vpop.permute.xlu0 %339 }
 0x32e   :  { %v329_v30 = vpop.permute.xlu1 %328  ;;  %v342_v37 = vmul.f32 %v340_v35, %v263_v9 }
 0x32f   :  { %v331_v31 = vmul.f32 %v329_v30, %v261_v63  ;;  %v360_v63 = vmul.f32 %v358_v38, %v266_v24  ;;  %v506_v24 = vld [vmem:[%s770_s2 + $0xd0] ss:$0 sm:$0xff] }
 0x330   :  { %v370_v3 = vpop.permute.xlu2 %369 }
 0x331   :  { %v337_v36 = vadd.f32 %v336_v32, %v331_v31  ;;  %v372_v9 = vmul.f32 %v370_v3, %v268_v34 }
 0x333   :  { %v343_v39 = vadd.f32 %v342_v37, %v337_v36 }
 0x335   :  { %v349_v43 = vadd.f32 %v348_v41, %v343_v39 }
 0x337   :  { %v352_v40 = vpop.permute.xlu1 %351 }
 0x338   :  { %v354_v42 = vmul.f32 %v352_v40, %v265_v18  ;;  %v42_v18 = vld [vmem:[%s770_s2 + $0xe0] sm:$0xff] }
 0x339   :  { %441 = vmatpush.msrb.mxu0 %v42_v18 }
 0x33a   :  { %v355_v62 = vadd.f32 %v354_v42, %v349_v43 }
 0x33b   :  { %442 = vmatpush.msrb.mxu0 %v41_v23 }
 0x33c   :  { %v361_v44 = vadd.f32 %v360_v63, %v355_v62 }
 0x340   :  { %v364_v4 = vpop.permute.xlu1 %363 }
 0x341   :  { %v366_v8 = vmul.f32 %v364_v4, %v267_v29 }
 0x343   :  { %v367_v45 = vadd.f32 %v366_v8, %v361_v44 }
 0x345   :  { %v373_v11 = vadd.f32 %v372_v9, %v367_v45 }
 0x347   :  { %473 = vmatmul.msk.f32.vlgmr.msra.gmra.mxu0 %vm82_vm4, %v373_v11 }
 0x3c4   :  { %v394_v29 = vpop.f32.mrf.mxu0 }
 0x3c5   :  { %v418_v33 = vadd.f32 %v417_v28, %v394_v29 }
 0x3c7   :  { %v421_v34 = vadd.f32 %v506_v24, %v418_v33 }
 0x3c9   :  { %v422_v46 = vmax.f32 %v421_v34, 0.0 }
 0x3cb   :  { %475 = vmatmul.msk.f32.vlgmr.msrb.gmra.mxu0 %vm195_vm5, %v422_v46 }
 0x448   :  { %v444_v48 = vpop.f32.mrf.mxu0 }
 0x449   :  { %v445_v49 = vadd.f32 %v507_v47, %v444_v48 }
 0x44b   :  { %512 = vtanh.f32 %v445_v49 }
 0x451   :  { %v513_v50 = vpop.eup %512 }
 0x452   :  { %448 = vst.msk [vmem:[%s773_s3] sm:$0xff] %vm314_vm11, %v513_v50 }

</bundles_post_ra>
